<compile_context>
chip_gen: v5e
topology: v5e:2x2
jax: 0.10.0
libtpu: 0.0.40
codegen_flags: <defaults>
</compile_context>

<pallas_src>
import math
import jax
import jax.numpy as jnp
from jax.experimental import pallas as pl
from jax.experimental.pallas import tpu as pltpu

LANE = 128  # TPU vreg lane width; make every layer's output lane-dense.


def _round_up(n, m):
    return ((n + m - 1) // m) * m


def _make_mlp_kernel(n_layers):
    """Fused MLP kernel: n_layers of (dot on MXU + bias add on VPU + tanh on EUP).

    Ref order: x_ref, (w1, b1), (w2, b2), ..., o_ref
    """

    def kernel(x_ref, *refs):
        o_ref = refs[-1]
        h = x_ref[...]
        for i in range(n_layers):
            w_ref = refs[2 * i]
            b_ref = refs[2 * i + 1]
            acc = jnp.dot(h, w_ref[...], preferred_element_type=jnp.float32)
            h = jnp.tanh(acc + b_ref[...])  # b_ref is (1, Out_p) -> broadcast
        o_ref[...] = h.astype(o_ref.dtype)

    return kernel


def init_params(nn_list, key):
    """Deterministic init matching PyTorch nn.Linear default:
    W, b ~ U(-1/sqrt(fan_in), 1/sqrt(fan_in)).  Weights kept as (in, out)."""
    params = []
    for i in range(len(nn_list) - 1):
        fan_in, fan_out = nn_list[i], nn_list[i + 1]
        key, kw, kb = jax.random.split(key, 3)
        bound = 1.0 / math.sqrt(fan_in)
        # PyTorch stores (out, in); sample in that shape then transpose.
        w_pt = jax.random.uniform(kw, (fan_out, fan_in), jnp.float32, -bound, bound)
        b = jax.random.uniform(kb, (fan_out,), jnp.float32, -bound, bound)
        params.append((w_pt.T, b))
    return params


def pad_params(params):
    """Zero-pad each layer to lane-dense (multiple-of-128) output width.

    First layer keeps its true input-row count (matches the unpadded x);
    later layers' input rows are padded to match the previous padded output.
    Done ONCE; padded weights are reused every forward call.
    """
    padded = []
    for li, (w, b) in enumerate(params):
        fan_in, fan_out = w.shape
        in_rows = fan_in if li == 0 else _round_up(fan_in, LANE)
        out_cols = _round_up(fan_out, LANE)
        w_p = jnp.zeros((in_rows, out_cols), w.dtype).at[:fan_in, :fan_out].set(w)
        b_p = jnp.zeros((1, out_cols), b.dtype).at[0, :fan_out].set(b)
        padded.append((w_p, b_p))
    return padded


def neural_network_forward(x, padded_params, out_dim):
    """Equivalent of NeuralNetwork.forward, fused into a single Pallas call."""
    B = x.shape[0]
    n_layers = len(padded_params)
    out_pad = padded_params[-1][0].shape[1]

    flat = []
    for w, b in padded_params:
        flat.append(w)
        flat.append(b)

    out_padded = pl.pallas_call(
        _make_mlp_kernel(n_layers),
        out_shape=jax.ShapeDtypeStruct((B, out_pad), x.dtype),
        in_specs=[pl.BlockSpec(memory_space=pltpu.MemorySpace.VMEM)]
        * (1 + 2 * n_layers),
        out_specs=pl.BlockSpec(memory_space=pltpu.MemorySpace.VMEM),
    )(x, *flat)

    # Slice the lane padding back off (cheap wrapper-side slice).
    return out_padded[:, :out_dim]


def _reference_forward(x, params):
    for w, b in params:
        x = jnp.tanh(x @ w + b)
    return x


if __name__ == "__main__":
    key = jax.random.PRNGKey(0)
    nn_list = [16, 32, 32, 8]  # [input dim, hidden..., output dim]
    batch = 8

    kx, kp = jax.random.split(key)
    x = jax.random.normal(kx, (batch, nn_list[0]), jnp.float32)

    params = init_params(nn_list, kp)      # true (in, out) weights for reference
    padded_params = pad_params(params)     # lane-dense padded weights for kernel

    out = neural_network_forward(x, padded_params, nn_list[-1])
    out = jax.block_until_ready(out)

    # Sanity check against a plain-JAX reference on the unpadded params.
    ref = _reference_forward(x, params)
    assert out.shape == (batch, nn_list[-1])
    assert jnp.allclose(out, ref, atol=1e-5, rtol=1e-5)

    print("KERNEL_OK")
</pallas_src>

<mosaic_0001>
module attributes {stable_mosaic.version = 11 : i64} {
  func.func @kernel(%arg0: memref<8x16xf32, #tpu.memory_space<vmem>>, %arg1: memref<16x128xf32, #tpu.memory_space<vmem>>, %arg2: memref<1x128xf32, #tpu.memory_space<vmem>>, %arg3: memref<128x128xf32, #tpu.memory_space<vmem>>, %arg4: memref<1x128xf32, #tpu.memory_space<vmem>>, %arg5: memref<128x128xf32, #tpu.memory_space<vmem>>, %arg6: memref<1x128xf32, #tpu.memory_space<vmem>>, %arg7: memref<8x128xf32, #tpu.memory_space<vmem>>) attributes {dimension_semantics = [], scalar_prefetch = 0 : i64, scratch_operands = 0 : i64, tpu.core_type = #tpu.core_type<tc>} {
    %c0 = arith.constant 0 : index
    %c0_0 = arith.constant 0 : index
    %0 = vector.load %arg0[%c0, %c0_0] : memref<8x16xf32, #tpu.memory_space<vmem>>, vector<8x16xf32>
    %c0_1 = arith.constant 0 : index
    %c0_2 = arith.constant 0 : index
    %1 = vector.load %arg1[%c0_1, %c0_2] : memref<16x128xf32, #tpu.memory_space<vmem>>, vector<16x128xf32>
    %cst = arith.constant dense<0.000000e+00> : vector<8x128xf32>
    %2 = tpu.matmul %0, %1, %cst {dimension_numbers = #tpu.dot_dimension_numbers<[1], [0], [0], [1], [0, 0, 1, 1], [], []>} : vector<8x16xf32>, vector<16x128xf32>, vector<8x128xf32> -> vector<8x128xf32>
    %c0_3 = arith.constant 0 : index
    %c0_4 = arith.constant 0 : index
    %3 = vector.load %arg2[%c0_3, %c0_4] : memref<1x128xf32, #tpu.memory_space<vmem>>, vector<1x128xf32>
    %4 = vector.broadcast %3 : vector<1x128xf32> to vector<8x128xf32>
    %5 = arith.addf %2, %4 : vector<8x128xf32>
    %6 = math.tanh %5 : vector<8x128xf32>
    %c0_5 = arith.constant 0 : index
    %c0_6 = arith.constant 0 : index
    %7 = vector.load %arg3[%c0_5, %c0_6] : memref<128x128xf32, #tpu.memory_space<vmem>>, vector<128x128xf32>
    %cst_7 = arith.constant dense<0.000000e+00> : vector<8x128xf32>
    %8 = tpu.matmul %6, %7, %cst_7 {dimension_numbers = #tpu.dot_dimension_numbers<[1], [0], [0], [1], [0, 0, 1, 1], [], []>} : vector<8x128xf32>, vector<128x128xf32>, vector<8x128xf32> -> vector<8x128xf32>
    %c0_8 = arith.constant 0 : index
    %c0_9 = arith.constant 0 : index
    %9 = vector.load %arg4[%c0_8, %c0_9] : memref<1x128xf32, #tpu.memory_space<vmem>>, vector<1x128xf32>
    %10 = vector.broadcast %9 : vector<1x128xf32> to vector<8x128xf32>
    %11 = arith.addf %8, %10 : vector<8x128xf32>
    %12 = math.tanh %11 : vector<8x128xf32>
    %c0_10 = arith.constant 0 : index
    %c0_11 = arith.constant 0 : index
    %13 = vector.load %arg5[%c0_10, %c0_11] : memref<128x128xf32, #tpu.memory_space<vmem>>, vector<128x128xf32>
    %cst_12 = arith.constant dense<0.000000e+00> : vector<8x128xf32>
    %14 = tpu.matmul %12, %13, %cst_12 {dimension_numbers = #tpu.dot_dimension_numbers<[1], [0], [0], [1], [0, 0, 1, 1], [], []>} : vector<8x128xf32>, vector<128x128xf32>, vector<8x128xf32> -> vector<8x128xf32>
    %c0_13 = arith.constant 0 : index
    %c0_14 = arith.constant 0 : index
    %15 = vector.load %arg6[%c0_13, %c0_14] : memref<1x128xf32, #tpu.memory_space<vmem>>, vector<1x128xf32>
    %16 = vector.broadcast %15 : vector<1x128xf32> to vector<8x128xf32>
    %17 = arith.addf %14, %16 : vector<8x128xf32>
    %18 = math.tanh %17 : vector<8x128xf32>
    %c0_15 = arith.constant 0 : index
    %c0_16 = arith.constant 0 : index
    %19 = vector.load %arg7[%c0_15, %c0_16] : memref<8x128xf32, #tpu.memory_space<vmem>>, vector<8x128xf32>
    tpu.vector_store %arg7[%c0_15, %c0_16], %18 {strides = array<i32>} : memref<8x128xf32, #tpu.memory_space<vmem>>, vector<8x128xf32>,
    return
  }
}

</mosaic_0001>

<bundles_post_ra>
// kernel: tpu_custom_call.1
= control target key start
LH: loop header
LB: loop body
LE: loop exit
PB: predicated region body
PF: predicated region fallthrough
CT: control target
= control target key end

     0   :  { %12 = vsyncpa [#allocation3], 0  ;;  %s438_s0 = inlined_call_operand.hbm [shape: f32[8,16], index: 0, kind: input, shape index: {}]   ;;  %s439_s1 = inlined_call_operand.hbm [shape: f32[16,128], index: 1, kind: input, shape index: {}]   ;;  %s440_s2 = inlined_call_operand.vmem [shape: f32[1,128], index: 2, kind: input, shape index: {}]   ;;  %s441_s3 = inlined_call_operand.hbm [shape: f32[128,128], index: 3, kind: input, shape index: {}]   ;;  %s442_s4 = inlined_call_operand.vmem [shape: f32[1,128], index: 4, kind: input, shape index: {}]   ;;  %s443_s5 = inlined_call_operand.hbm [shape: f32[128,128], index: 5, kind: input, shape index: {}]   ;;  %s444_s6 = inlined_call_operand.vmem [shape: f32[1,128], index: 6, kind: input, shape index: {}]   ;;  %s445_s7 = inlined_call_operand.hbm [shape: f32[8,128], index: 7, kind: output, shape index: {}]  }
   0x1   :  { %13 = vsyncpa [#allocation6], 0 }
   0x2   :  { %14 = vsyncpa [#allocation9], 0  ;;  %s31_s26 = sshll.u32 %s439_s1, 4  ;;  %s32_s26 = int_to_ptr.hbm [resolvable:$true] %s31_s26 }
   0x3   :  { %15 = vsyncpa [#allocation4], 0  ;;  %s367_s27 = smov [#allocation5]   ;;  %s21_s8 = sshll.u32 %s438_s0, 4  ;;  %s22_s8 = int_to_ptr.hbm [resolvable:$true] %s21_s8 }
   0x4   :  { %s33_s28 = sshll.u32 %s367_s27, 4  ;;  %s368_s9 = smov 128   ;;  %s34_s28 = int_to_ptr.vmem [resolvable:$true] %s33_s28 }
   0x5   :  { %s369_s10 = smov 8   ;;  %s370_s11 = smov [#allocation2]  }
   0x6   :  { %39 = dma.hbm_to_vmem [thread:$0]  %s32_s26, 256, %s34_s28, [#allocation6], %s368_s9, %s368_s9, %s369_s10  }
   0x7   :  { %s23_s12 = sshll.u32 %s370_s11, 4  ;;  %s46_s15 = sshll.u32 %s441_s3, 4  ;;  %s24_s12 = int_to_ptr.vmem [resolvable:$true] %s23_s12  ;;  %s47_s15 = int_to_ptr.hbm [resolvable:$true] %s46_s15 }
   0x8   :  { %26 = dma.hbm_to_vmem [thread:$0]  %s22_s8, 128, %s24_s12, [#allocation3]  }
   0x9   :  { %s61_s17 = sshll.u32 %s443_s5, 4  ;;  %s371_s18 = smov [#allocation7]   ;;  %s62_s17 = int_to_ptr.hbm [resolvable:$true] %s61_s17 }
   0xa   :  { %s48_s19 = sshll.u32 %s371_s18, 4  ;;  %s372_s0 = smov [#allocation8]   ;;  %s49_s19 = int_to_ptr.vmem [resolvable:$true] %s48_s19 }
   0xb   :  { %54 = dma.hbm_to_vmem [thread:$0]  %s47_s15, 2048, %s49_s19, [#allocation6], %s368_s9, %s368_s9, %s369_s10  }
   0xc   :  { %s63_s20 = sshll.u32 %s372_s0, 4  ;;  %s64_s20 = int_to_ptr.vmem [resolvable:$true] %s63_s20 }
   0xd   :  { %69 = dma.hbm_to_vmem [thread:$0]  %s62_s17, 2048, %s64_s20, [#allocation9], %s368_s9, %s368_s9, %s369_s10  }
   0xe   :  { %359 = dma.done.wait [#allocation3], 128  }
   0xf   :  { %360 = vsyncadd [#allocation3], 4294967168 }
  0x10   :  { %361 = dma.done.wait [#allocation6], 2304  }
  0x11   :  { %362 = vsyncadd [#allocation6], 4294964992 }
  0x12   :  { %363 = dma.done.wait [#allocation9], 2048  }
  0x13   :  { %364 = vsyncadd [#allocation9], 4294965248  ;;  %v90_v0 = vld [vmem:[#allocation5 + $0x8] sm:$0xff]  ;;  %v89_v1 = vld [vmem:[#allocation5] sm:$0xff]  ;;  %vm95_vm0 = vcmask 130048   ;;  %s373_s24 = smov [#allocation10]  }
  0x14   :  { %113 = vmatpush.msra.mxu0 %v90_v0  ;;  %v88_v2 = vld [vmem:[#allocation2] sm:$0xff]  ;;  %v135_v3 = vld [vmem:[#allocation7 + $0x78] sm:$0xff]  ;;  %v134_v4 = vld [vmem:[#allocation7 + $0x70] sm:$0xff]  ;;  %s208_s25 = sshll.u32 %s373_s24, 4  ;;  %s210_s28 = sshll.u32 %s445_s7, 4  ;;  %s209_s25 = int_to_ptr.vmem [resolvable:$true] %s208_s25  ;;  %s211_s28 = int_to_ptr.hbm [resolvable:$true] %s210_s28 }
  0x15   :  { %140 = vmatpush.msra.mxu1 %v135_v3  ;;  %v133_v5 = vld [vmem:[#allocation7 + $0x68] sm:$0xff]  ;;  %v132_v6 = vld [vmem:[#allocation7 + $0x60] sm:$0xff]  ;;  %v131_v7 = vld [vmem:[#allocation7 + $0x58] sm:$0xff] }
  0x16   :  { %114 = vmatpush.msra.mxu0 %v89_v1  ;;  %v130_v8 = vld [vmem:[#allocation7 + $0x50] sm:$0xff]  ;;  %v129_v9 = vld [vmem:[#allocation7 + $0x48] sm:$0xff]  ;;  %v128_v10 = vld [vmem:[#allocation7 + $0x40] sm:$0xff] }
  0x17   :  { %222 = vmatmul.msk.f32.vlgmr.msra.gmra.mxu0 %vm95_vm0, %v88_v2  ;;  %141 = vmatpush.msra.mxu1 %v134_v4  ;;  %v127_v11 = vld [vmem:[#allocation7 + $0x38] sm:$0xff]  ;;  %v126_v12 = vld [vmem:[#allocation7 + $0x30] sm:$0xff]  ;;  %v125_v13 = vld [vmem:[#allocation7 + $0x28] sm:$0xff] }
  0x18   :  { %v124_v14 = vld [vmem:[#allocation7 + $0x20] sm:$0xff]  ;;  %v123_v15 = vld [vmem:[#allocation7 + $0x18] sm:$0xff]  ;;  %v122_v16 = vld [vmem:[#allocation7 + $0x10] sm:$0xff] }
  0x19   :  { %142 = vmatpush.msra.mxu1 %v133_v5  ;;  %v121_v17 = vld [vmem:[#allocation7 + $0x8] sm:$0xff]  ;;  %v120_v18 = vld [vmem:[#allocation7] sm:$0xff]  ;;  %v176_v19 = vld [vmem:[#allocation8 + $0x78] sm:$0xff] }
  0x1a   :  { %v175_v20 = vld [vmem:[#allocation8 + $0x70] sm:$0xff]  ;;  %181 = vmatpush.msra.mxu2 %v176_v19  ;;  %v174_v21 = vld [vmem:[#allocation8 + $0x68] sm:$0xff]  ;;  %v173_v22 = vld [vmem:[#allocation8 + $0x60] sm:$0xff] }
  0x1b   :  { %143 = vmatpush.msra.mxu1 %v132_v6  ;;  %v172_v23 = vld [vmem:[#allocation8 + $0x58] sm:$0xff]  ;;  %v171_v24 = vld [vmem:[#allocation8 + $0x50] sm:$0xff]  ;;  %v170_v25 = vld [vmem:[#allocation8 + $0x48] sm:$0xff] }
  0x1c   :  { %182 = vmatpush.msra.mxu2 %v175_v20  ;;  %v169_v26 = vld [vmem:[#allocation8 + $0x40] sm:$0xff]  ;;  %v168_v27 = vld [vmem:[#allocation8 + $0x38] sm:$0xff]  ;;  %v167_v28 = vld [vmem:[#allocation8 + $0x30] sm:$0xff] }
  0x1d   :  { %144 = vmatpush.msra.mxu1 %v131_v7  ;;  %v166_v29 = vld [vmem:[#allocation8 + $0x28] sm:$0xff]  ;;  %v165_v34 = vld [vmem:[#allocation8 + $0x20] sm:$0xff]  ;;  %v164_v35 = vld [vmem:[#allocation8 + $0x18] sm:$0xff] }
  0x1e   :  { %183 = vmatpush.msra.mxu2 %v174_v21  ;;  %v230_v30 = vld [vmem:[%s440_s2] ss:$0 sm:$0xff]  ;;  %v163_v36 = vld [vmem:[#allocation8 + $0x10] sm:$0xff]  ;;  %v161_v38 = vld [vmem:[#allocation8] sm:$0xff] }
  0x1f   :  { %145 = vmatpush.msra.mxu1 %v130_v8  ;;  %v162_v37 = vld [vmem:[#allocation8 + $0x8] sm:$0xff] }
  0x20   :  { %184 = vmatpush.msra.mxu2 %v173_v22  ;;  %v231_v39 = vld [vmem:[%s442_s4] ss:$0 sm:$0xff] }
  0x21   :  { %146 = vmatpush.msra.mxu1 %v129_v9  ;;  %v232_v43 = vld [vmem:[%s444_s6] ss:$0 sm:$0xff] }
  0x22   :  { %185 = vmatpush.msra.mxu2 %v172_v23 }
  0x23   :  { %147 = vmatpush.msra.mxu1 %v128_v10 }
  0x24   :  { %186 = vmatpush.msra.mxu2 %v171_v24 }
  0x25   :  { %148 = vmatpush.msra.mxu1 %v127_v11 }
  0x26   :  { %187 = vmatpush.msra.mxu2 %v170_v25 }
  0x27   :  { %149 = vmatpush.msra.mxu1 %v126_v12 }
  0x28   :  { %188 = vmatpush.msra.mxu2 %v169_v26 }
  0x29   :  { %150 = vmatpush.msra.mxu1 %v125_v13 }
  0x2a   :  { %189 = vmatpush.msra.mxu2 %v168_v27 }
  0x2b   :  { %151 = vmatpush.msra.mxu1 %v124_v14 }
  0x2c   :  { %190 = vmatpush.msra.mxu2 %v167_v28 }
  0x2d   :  { %152 = vmatpush.msra.mxu1 %v123_v15 }
  0x2e   :  { %191 = vmatpush.msra.mxu2 %v166_v29 }
  0x2f   :  { %153 = vmatpush.msra.mxu1 %v122_v16 }
  0x30   :  { %192 = vmatpush.msra.mxu2 %v165_v34 }
  0x31   :  { %154 = vmatpush.msra.mxu1 %v121_v17 }
  0x32   :  { %193 = vmatpush.msra.mxu2 %v164_v35 }
  0x33   :  { %155 = vmatpush.msra.mxu1 %v120_v18 }
  0x34   :  { %194 = vmatpush.msra.mxu2 %v163_v36 }
  0x36   :  { %195 = vmatpush.msra.mxu2 %v162_v37 }
  0x38   :  { %196 = vmatpush.msra.mxu2 %v161_v38 }
  0x94   :  { %v116_v31 = vpop.f32.mrf.mxu0 }
  0x95   :  { %v117_v32 = vadd.f32 %v230_v30, %v116_v31 }
  0x97   :  { %233 = vtanh.f32 %v117_v32 }
  0x9d   :  { %v234_v33 = vpop.eup %233 }
  0x9e   :  { %156 = vmatmul.f32.vlgmr.msra.gmra.mxu1 %v234_v33 }
 0x11b   :  { %v157_v40 = vpop.f32.mrf.mxu1 }
 0x11c   :  { %v158_v41 = vadd.f32 %v231_v39, %v157_v40 }
 0x11e   :  { %235 = vtanh.f32 %v158_v41 }
 0x124   :  { %v236_v42 = vpop.eup %235 }
 0x125   :  { %197 = vmatmul.f32.vlgmr.msra.gmra.mxu2 %v236_v42 }
 0x1a8   :  { %v198_v44 = vpop.f32.mrf.mxu2 }
 0x1a9   :  { %v199_v45 = vadd.f32 %v232_v43, %v198_v44 }
 0x1ab   :  { %237 = vtanh.f32 %v199_v45 }
 0x1b1   :  { %v238_v46 = vpop.eup %237 }
 0x1b2   :  { %202 = vst [vmem:[#allocation10] sm:$0xff] %v238_v46 }
 0x1b3   :  { %213 = dma.vmem_to_hbm [thread:$0]  %s209_s25, 128, %s211_s28, [#allocation4]  }
 0x1b4   :  { %365 = dma.done.wait [#allocation4], 128  }
 0x1b5   :  { %366 = vsyncadd [#allocation4], 4294967168 }
 0x1b6   :  { %218 = vsyncpa [#allocation3], 1 }
 0x1b7   :  { %219 = vsyncpa [#allocation6], 1 }
 0x1b8   :  { %220 = vsyncpa [#allocation9], 1 }
 0x1b9   :  { %221 = vsyncpa [#allocation4], 1 }

</bundles_post_ra>
